<compile_context>
chip_gen: v5e
topology: v5e:2x2
jax: 0.10.0
libtpu: 0.0.40
codegen_flags: <defaults>
</compile_context>

<pallas_src>
import functools

import jax
import jax.numpy as jnp
from jax import lax
from jax.experimental import pallas as pl
from jax.experimental.pallas import tpu as pltpu


def _attention_kernel(x_ref, wqkv_ref, wout_ref, bout_ref, o_ref, *,
                      batch: int, seq: int, heads: int, head_dim: int,
                      dim: int, scale: float):
    """Whole-problem attention in one invocation.

    x_ref    : (B*N, DIM)                activations (flattened batch*seq)
    wqkv_ref : (3*heads, DIM, head_dim)  head-major QKV projection weights
    wout_ref : (heads, head_dim, DIM)    head-major output projection weights
    bout_ref : (1, DIM)                  output projection bias
    o_ref    : (B*N, DIM)                output
    """
    x = x_ref[...]                                            # (B*N, DIM)

    # Per-head Q/K/V projections, shared across all batches.  Head blocks are
    # selected on the *leading* axis of the weight ref (cheap offset slice)
    # instead of lane-unaligned column slices of a fused (B*N, 3*DIM) tensor.
    # The softmax scale is folded into Q here (once per (B*N, d) tensor).
    qs, ks, vs = [], [], []
    for h in range(heads):                                    # static unroll
        qs.append(jnp.dot(x, wqkv_ref[h],
                          preferred_element_type=jnp.float32) * scale)
        ks.append(jnp.dot(x, wqkv_ref[heads + h],
                          preferred_element_type=jnp.float32))
        vs.append(jnp.dot(x, wqkv_ref[2 * heads + h],
                          preferred_element_type=jnp.float32))

    bias = bout_ref[...]                                      # (1, DIM)

    for b in range(batch):                                    # static unroll
        lo = b * seq                                          # sublane-aligned slice
        acc = jnp.zeros((seq, dim), dtype=jnp.float32)
        for h in range(heads):                                # static unroll
            qh = qs[h][lo:lo + seq]                           # (N, d), already scaled
            kh = ks[h][lo:lo + seq]                           # (N, d)
            vh = vs[h][lo:lo + seq]                           # (N, d)

            # dots = (q * scale) @ k^T, contracting the last dims directly on
            # the MXU -- no materialized transpose of K.
            dots = lax.dot_general(
                qh, kh, (((1,), (1,)), ((), ())),
                preferred_element_type=jnp.float32)           # (N, N)

            # Numerically-stable softmax; reciprocal runs on the EUP slot.
            dots = dots - jnp.max(dots, axis=-1, keepdims=True)
            e = jnp.exp(dots)
            attn = e * pl.reciprocal(
                jnp.sum(e, axis=-1, keepdims=True), approx=True)

            oh = jnp.dot(attn, vh,
                         preferred_element_type=jnp.float32)  # (N, d)
            # Fold this head's slice of the output projection straight into the
            # accumulator (no lane-axis concatenate of head outputs).
            acc = acc + jnp.dot(oh, wout_ref[h],
                                preferred_element_type=jnp.float32)  # (N, DIM)

        o_ref[lo:lo + seq, :] = (acc + bias).astype(o_ref.dtype)


def attention_forward(x, w_qkv, w_out, b_out, *, heads: int,
                      scale_with_head: bool = False):
    """Pallas wrapper. x: (B, N, DIM)."""
    b, n, dim = x.shape
    assert dim % heads == 0
    head_dim = dim // heads
    scale = (head_dim ** -0.5) if scale_with_head else (dim ** -0.5)

    # Flatten batch*seq so the projections see a single (B*N, DIM) operand and
    # the whole problem runs in ONE kernel invocation.
    x_flat = x.reshape(b * n, dim)

    # Head-major weight layouts so the kernel never slices the lane axis:
    #   w_qkv (DIM, 3*DIM) -> (3*heads, DIM, head_dim)   [q heads, k heads, v heads]
    #   w_out (DIM, DIM)   -> (heads, head_dim, DIM)
    w_qkv_hm = (w_qkv.reshape(dim, 3, heads, head_dim)
                .transpose(1, 2, 0, 3)
                .reshape(3 * heads, dim, head_dim))
    w_out_hm = w_out.reshape(heads, head_dim, dim)
    b_out_2d = b_out.reshape(1, dim)

    kernel = functools.partial(
        _attention_kernel, batch=b, seq=n, heads=heads,
        head_dim=head_dim, dim=dim, scale=scale)

    # TODO(synk): with large DIM / long sequences the fully VMEM-resident
    #             operands would exceed v7x's 64 MiB VMEM; tile over batch /
    #             sequence via a grid there.
    out_flat = pl.pallas_call(
        kernel,
        out_shape=jax.ShapeDtypeStruct((b * n, dim), x.dtype),
        in_specs=[pl.BlockSpec(memory_space=pltpu.MemorySpace.VMEM)] * 4,
        out_specs=pl.BlockSpec(memory_space=pltpu.MemorySpace.VMEM),
    )(x_flat, w_qkv_hm, w_out_hm, b_out_2d)

    return out_flat.reshape(b, n, dim)


def _reference(x, w_qkv, w_out, b_out, *, heads, scale_with_head=False):
    """Pure-JAX reference mirroring the PyTorch forward (mask=None)."""
    b, n, dim = x.shape
    d = dim // heads
    scale = (d ** -0.5) if scale_with_head else (dim ** -0.5)
    qkv = x @ w_qkv                                           # (b, n, 3*dim)
    q, k, v = jnp.split(qkv, 3, axis=-1)

    def to_heads(t):                                          # 'b n (h d) -> b h n d'
        return t.reshape(b, n, heads, d).transpose(0, 2, 1, 3)

    q, k, v = map(to_heads, (q, k, v))
    dots = jnp.einsum('bhid,bhjd->bhij', q, k) * scale
    attn = jax.nn.softmax(dots, axis=-1)
    out = jnp.einsum('bhij,bhjd->bhid', attn, v)
    out = out.transpose(0, 2, 1, 3).reshape(b, n, dim)        # 'b h n d -> b n (h d)'
    return out @ w_out + b_out[0]


if __name__ == "__main__":
    B, N, DIM, HEADS = 2, 8, 32, 4

    key = jax.random.PRNGKey(0)
    k0, k1, k2, k3 = jax.random.split(key, 4)
    x = jax.random.normal(k0, (B, N, DIM), dtype=jnp.float32)
    # Deterministic synthetic parameters (shapes implied by nn.Linear in __init__).
    w_qkv = jax.random.normal(k1, (DIM, 3 * DIM), dtype=jnp.float32) * 0.05
    w_out = jax.random.normal(k2, (DIM, DIM), dtype=jnp.float32) * 0.05
    b_out = jax.random.normal(k3, (1, DIM), dtype=jnp.float32) * 0.05

    y = attention_forward(x, w_qkv, w_out, b_out, heads=HEADS)
    y = jax.block_until_ready(y)

    y_ref = _reference(x, w_qkv, w_out, b_out, heads=HEADS)
    assert y.shape == (B, N, DIM)
    # Tolerance accounts for the EUP approximate reciprocal in the softmax.
    assert jnp.allclose(y, y_ref, atol=2e-3, rtol=2e-3), "mismatch vs reference"

    print("KERNEL_OK")
</pallas_src>

<mosaic_0001>
module attributes {stable_mosaic.version = 11 : i64} {
  func.func @_attention_kernel(%arg0: memref<16x32xf32, #tpu.memory_space<vmem>>, %arg1: memref<12x32x8xf32, #tpu.memory_space<vmem>>, %arg2: memref<4x8x32xf32, #tpu.memory_space<vmem>>, %arg3: memref<1x32xf32, #tpu.memory_space<vmem>>, %arg4: memref<16x32xf32, #tpu.memory_space<vmem>>) attributes {dimension_semantics = [], scalar_prefetch = 0 : i64, scratch_operands = 0 : i64, tpu.core_type = #tpu.core_type<tc>} {
    %c0 = arith.constant 0 : index
    %c0_0 = arith.constant 0 : index
    %0 = vector.load %arg0[%c0, %c0_0] : memref<16x32xf32, #tpu.memory_space<vmem>>, vector<16x32xf32>
    %c0_1 = arith.constant 0 : index
    %c0_2 = arith.constant 0 : index
    %c0_3 = arith.constant 0 : index
    %1 = vector.load %arg1[%c0_1, %c0_2, %c0_3] : memref<12x32x8xf32, #tpu.memory_space<vmem>>, vector<1x32x8xf32>
    %2 = vector.shape_cast %1 : vector<1x32x8xf32> to vector<32x8xf32>
    %cst = arith.constant dense<0.000000e+00> : vector<16x8xf32>
    %3 = tpu.matmul %0, %2, %cst {dimension_numbers = #tpu.dot_dimension_numbers<[1], [0], [0], [1], [0, 0, 1, 1], [], []>} : vector<16x32xf32>, vector<32x8xf32>, vector<16x8xf32> -> vector<16x8xf32>
    %cst_4 = arith.constant 0.176776692 : f32
    %4 = vector.broadcast %cst_4 : f32 to vector<16x8xf32>
    %5 = arith.mulf %3, %4 : vector<16x8xf32>
    %c4 = arith.constant 4 : index
    %c0_5 = arith.constant 0 : index
    %c0_6 = arith.constant 0 : index
    %6 = vector.load %arg1[%c4, %c0_5, %c0_6] : memref<12x32x8xf32, #tpu.memory_space<vmem>>, vector<1x32x8xf32>
    %7 = vector.shape_cast %6 : vector<1x32x8xf32> to vector<32x8xf32>
    %cst_7 = arith.constant dense<0.000000e+00> : vector<16x8xf32>
    %8 = tpu.matmul %0, %7, %cst_7 {dimension_numbers = #tpu.dot_dimension_numbers<[1], [0], [0], [1], [0, 0, 1, 1], [], []>} : vector<16x32xf32>, vector<32x8xf32>, vector<16x8xf32> -> vector<16x8xf32>
    %c8 = arith.constant 8 : index
    %c0_8 = arith.constant 0 : index
    %c0_9 = arith.constant 0 : index
    %9 = vector.load %arg1[%c8, %c0_8, %c0_9] : memref<12x32x8xf32, #tpu.memory_space<vmem>>, vector<1x32x8xf32>
    %10 = vector.shape_cast %9 : vector<1x32x8xf32> to vector<32x8xf32>
    %cst_10 = arith.constant dense<0.000000e+00> : vector<16x8xf32>
    %11 = tpu.matmul %0, %10, %cst_10 {dimension_numbers = #tpu.dot_dimension_numbers<[1], [0], [0], [1], [0, 0, 1, 1], [], []>} : vector<16x32xf32>, vector<32x8xf32>, vector<16x8xf32> -> vector<16x8xf32>
    %c1 = arith.constant 1 : index
    %c0_11 = arith.constant 0 : index
    %c0_12 = arith.constant 0 : index
    %12 = vector.load %arg1[%c1, %c0_11, %c0_12] : memref<12x32x8xf32, #tpu.memory_space<vmem>>, vector<1x32x8xf32>
    %13 = vector.shape_cast %12 : vector<1x32x8xf32> to vector<32x8xf32>
    %cst_13 = arith.constant dense<0.000000e+00> : vector<16x8xf32>
    %14 = tpu.matmul %0, %13, %cst_13 {dimension_numbers = #tpu.dot_dimension_numbers<[1], [0], [0], [1], [0, 0, 1, 1], [], []>} : vector<16x32xf32>, vector<32x8xf32>, vector<16x8xf32> -> vector<16x8xf32>
    %cst_14 = arith.constant 0.176776692 : f32
    %15 = vector.broadcast %cst_14 : f32 to vector<16x8xf32>
    %16 = arith.mulf %14, %15 : vector<16x8xf32>
    %c5 = arith.constant 5 : index
    %c0_15 = arith.constant 0 : index
    %c0_16 = arith.constant 0 : index
    %17 = vector.load %arg1[%c5, %c0_15, %c0_16] : memref<12x32x8xf32, #tpu.memory_space<vmem>>, vector<1x32x8xf32>
    %18 = vector.shape_cast %17 : vector<1x32x8xf32> to vector<32x8xf32>
    %cst_17 = arith.constant dense<0.000000e+00> : vector<16x8xf32>
    %19 = tpu.matmul %0, %18, %cst_17 {dimension_numbers = #tpu.dot_dimension_numbers<[1], [0], [0], [1], [0, 0, 1, 1], [], []>} : vector<16x32xf32>, vector<32x8xf32>, vector<16x8xf32> -> vector<16x8xf32>
    %c9 = arith.constant 9 : index
    %c0_18 = arith.constant 0 : index
    %c0_19 = arith.constant 0 : index
    %20 = vector.load %arg1[%c9, %c0_18, %c0_19] : memref<12x32x8xf32, #tpu.memory_space<vmem>>, vector<1x32x8xf32>
    %21 = vector.shape_cast %20 : vector<1x32x8xf32> to vector<32x8xf32>
    %cst_20 = arith.constant dense<0.000000e+00> : vector<16x8xf32>
    %22 = tpu.matmul %0, %21, %cst_20 {dimension_numbers = #tpu.dot_dimension_numbers<[1], [0], [0], [1], [0, 0, 1, 1], [], []>} : vector<16x32xf32>, vector<32x8xf32>, vector<16x8xf32> -> vector<16x8xf32>
    %c2 = arith.constant 2 : index
    %c0_21 = arith.constant 0 : index
    %c0_22 = arith.constant 0 : index
    %23 = vector.load %arg1[%c2, %c0_21, %c0_22] : memref<12x32x8xf32, #tpu.memory_space<vmem>>, vector<1x32x8xf32>
    %24 = vector.shape_cast %23 : vector<1x32x8xf32> to vector<32x8xf32>
    %cst_23 = arith.constant dense<0.000000e+00> : vector<16x8xf32>
    %25 = tpu.matmul %0, %24, %cst_23 {dimension_numbers = #tpu.dot_dimension_numbers<[1], [0], [0], [1], [0, 0, 1, 1], [], []>} : vector<16x32xf32>, vector<32x8xf32>, vector<16x8xf32> -> vector<16x8xf32>
    %cst_24 = arith.constant 0.176776692 : f32
    %26 = vector.broadcast %cst_24 : f32 to vector<16x8xf32>
    %27 = arith.mulf %25, %26 : vector<16x8xf32>
    %c6 = arith.constant 6 : index
    %c0_25 = arith.constant 0 : index
    %c0_26 = arith.constant 0 : index
    %28 = vector.load %arg1[%c6, %c0_25, %c0_26] : memref<12x32x8xf32, #tpu.memory_space<vmem>>, vector<1x32x8xf32>
    %29 = vector.shape_cast %28 : vector<1x32x8xf32> to vector<32x8xf32>
    %cst_27 = arith.constant dense<0.000000e+00> : vector<16x8xf32>
    %30 = tpu.matmul %0, %29, %cst_27 {dimension_numbers = #tpu.dot_dimension_numbers<[1], [0], [0], [1], [0, 0, 1, 1], [], []>} : vector<16x32xf32>, vector<32x8xf32>, vector<16x8xf32> -> vector<16x8xf32>
    %c10 = arith.constant 10 : index
    %c0_28 = arith.constant 0 : index
    %c0_29 = arith.constant 0 : index
    %31 = vector.load %arg1[%c10, %c0_28, %c0_29] : memref<12x32x8xf32, #tpu.memory_space<vmem>>, vector<1x32x8xf32>
    %32 = vector.shape_cast %31 : vector<1x32x8xf32> to vector<32x8xf32>
    %cst_30 = arith.constant dense<0.000000e+00> : vector<16x8xf32>
    %33 = tpu.matmul %0, %32, %cst_30 {dimension_numbers = #tpu.dot_dimension_numbers<[1], [0], [0], [1], [0, 0, 1, 1], [], []>} : vector<16x32xf32>, vector<32x8xf32>, vector<16x8xf32> -> vector<16x8xf32>
    %c3 = arith.constant 3 : index
    %c0_31 = arith.constant 0 : index
    %c0_32 = arith.constant 0 : index
    %34 = vector.load %arg1[%c3, %c0_31, %c0_32] : memref<12x32x8xf32, #tpu.memory_space<vmem>>, vector<1x32x8xf32>
    %35 = vector.shape_cast %34 : vector<1x32x8xf32> to vector<32x8xf32>
    %cst_33 = arith.constant dense<0.000000e+00> : vector<16x8xf32>
    %36 = tpu.matmul %0, %35, %cst_33 {dimension_numbers = #tpu.dot_dimension_numbers<[1], [0], [0], [1], [0, 0, 1, 1], [], []>} : vector<16x32xf32>, vector<32x8xf32>, vector<16x8xf32> -> vector<16x8xf32>
    %cst_34 = arith.constant 0.176776692 : f32
    %37 = vector.broadcast %cst_34 : f32 to vector<16x8xf32>
    %38 = arith.mulf %36, %37 : vector<16x8xf32>
    %c7 = arith.constant 7 : index
    %c0_35 = arith.constant 0 : index
    %c0_36 = arith.constant 0 : index
    %39 = vector.load %arg1[%c7, %c0_35, %c0_36] : memref<12x32x8xf32, #tpu.memory_space<vmem>>, vector<1x32x8xf32>
    %40 = vector.shape_cast %39 : vector<1x32x8xf32> to vector<32x8xf32>
    %cst_37 = arith.constant dense<0.000000e+00> : vector<16x8xf32>
    %41 = tpu.matmul %0, %40, %cst_37 {dimension_numbers = #tpu.dot_dimension_numbers<[1], [0], [0], [1], [0, 0, 1, 1], [], []>} : vector<16x32xf32>, vector<32x8xf32>, vector<16x8xf32> -> vector<16x8xf32>
    %c11 = arith.constant 11 : index
    %c0_38 = arith.constant 0 : index
    %c0_39 = arith.constant 0 : index
    %42 = vector.load %arg1[%c11, %c0_38, %c0_39] : memref<12x32x8xf32, #tpu.memory_space<vmem>>, vector<1x32x8xf32>
    %43 = vector.shape_cast %42 : vector<1x32x8xf32> to vector<32x8xf32>
    %cst_40 = arith.constant dense<0.000000e+00> : vector<16x8xf32>
    %44 = tpu.matmul %0, %43, %cst_40 {dimension_numbers = #tpu.dot_dimension_numbers<[1], [0], [0], [1], [0, 0, 1, 1], [], []>} : vector<16x32xf32>, vector<32x8xf32>, vector<16x8xf32> -> vector<16x8xf32>
    %c0_41 = arith.constant 0 : index
    %c0_42 = arith.constant 0 : index
    %45 = vector.load %arg3[%c0_41, %c0_42] : memref<1x32xf32, #tpu.memory_space<vmem>>, vector<1x32xf32>
    %cst_43 = arith.constant 0.000000e+00 : f32
    %46 = vector.broadcast %cst_43 : f32 to vector<8x32xf32>
    %47 = vector.extract_strided_slice %5 {offsets = [0, 0], sizes = [8, 8], strides = [1, 1]} : vector<16x8xf32> to vector<8x8xf32>
    %48 = vector.extract_strided_slice %8 {offsets = [0, 0], sizes = [8, 8], strides = [1, 1]} : vector<16x8xf32> to vector<8x8xf32>
    %49 = vector.extract_strided_slice %11 {offsets = [0, 0], sizes = [8, 8], strides = [1, 1]} : vector<16x8xf32> to vector<8x8xf32>
    %cst_44 = arith.constant dense<0.000000e+00> : vector<8x8xf32>
    %50 = tpu.matmul %47, %48, %cst_44 {dimension_numbers = #tpu.dot_dimension_numbers<[1], [1], [0], [0], [0, 0, 1, 0], [], []>} : vector<8x8xf32>, vector<8x8xf32>, vector<8x8xf32> -> vector<8x8xf32>
    %cst_45 = arith.constant dense<0xFF800000> : vector<8xf32>
    %51 = vector.multi_reduction <maximumf>, %50, %cst_45 [1] : vector<8x8xf32> to vector<8xf32>
    %52 = vector.shape_cast %51 : vector<8xf32> to vector<8x1xf32>
    %53 = vector.broadcast %52 : vector<8x1xf32> to vector<8x8xf32>
    %54 = arith.subf %50, %53 : vector<8x8xf32>
    %55 = math.exp %54 : vector<8x8xf32>
    %cst_46 = arith.constant dense<0.000000e+00> : vector<8xf32>
    %56 = vector.multi_reduction <add>, %55, %cst_46 [1] : vector<8x8xf32> to vector<8xf32>
    %57 = vector.shape_cast %56 : vector<8xf32> to vector<8x1xf32>
    %58 = tpu.reciprocal %57 {approx = true} : vector<8x1xf32> -> vector<8x1xf32>
    %59 = vector.broadcast %58 : vector<8x1xf32> to vector<8x8xf32>
    %60 = arith.mulf %55, %59 : vector<8x8xf32>
    %cst_47 = arith.constant dense<0.000000e+00> : vector<8x8xf32>
    %61 = tpu.matmul %60, %49, %cst_47 {dimension_numbers = #tpu.dot_dimension_numbers<[1], [0], [0], [1], [0, 0, 1, 1], [], []>} : vector<8x8xf32>, vector<8x8xf32>, vector<8x8xf32> -> vector<8x8xf32>
    %c0_48 = arith.constant 0 : index
    %c0_49 = arith.constant 0 : index
    %c0_50 = arith.constant 0 : index
    %62 = vector.load %arg2[%c0_48, %c0_49, %c0_50] : memref<4x8x32xf32, #tpu.memory_space<vmem>>, vector<1x8x32xf32>
    %63 = vector.shape_cast %62 : vector<1x8x32xf32> to vector<8x32xf32>
    %cst_51 = arith.constant dense<0.000000e+00> : vector<8x32xf32>
    %64 = tpu.matmul %61, %63, %cst_51 {dimension_numbers = #tpu.dot_dimension_numbers<[1], [0], [0], [1], [0, 0, 1, 1], [], []>} : vector<8x8xf32>, vector<8x32xf32>, vector<8x32xf32> -> vector<8x32xf32>
    %65 = arith.addf %46, %64 : vector<8x32xf32>
    %66 = vector.extract_strided_slice %16 {offsets = [0, 0], sizes = [8, 8], strides = [1, 1]} : vector<16x8xf32> to vector<8x8xf32>
    %67 = vector.extract_strided_slice %19 {offsets = [0, 0], sizes = [8, 8], strides = [1, 1]} : vector<16x8xf32> to vector<8x8xf32>
    %68 = vector.extract_strided_slice %22 {offsets = [0, 0], sizes = [8, 8], strides = [1, 1]} : vector<16x8xf32> to vector<8x8xf32>
    %cst_52 = arith.constant dense<0.000000e+00> : vector<8x8xf32>
    %69 = tpu.matmul %66, %67, %cst_52 {dimension_numbers = #tpu.dot_dimension_numbers<[1], [1], [0], [0], [0, 0, 1, 0], [], []>} : vector<8x8xf32>, vector<8x8xf32>, vector<8x8xf32> -> vector<8x8xf32>
    %cst_53 = arith.constant dense<0xFF800000> : vector<8xf32>
    %70 = vector.multi_reduction <maximumf>, %69, %cst_53 [1] : vector<8x8xf32> to vector<8xf32>
    %71 = vector.shape_cast %70 : vector<8xf32> to vector<8x1xf32>
    %72 = vector.broadcast %71 : vector<8x1xf32> to vector<8x8xf32>
    %73 = arith.subf %69, %72 : vector<8x8xf32>
    %74 = math.exp %73 : vector<8x8xf32>
    %cst_54 = arith.constant dense<0.000000e+00> : vector<8xf32>
    %75 = vector.multi_reduction <add>, %74, %cst_54 [1] : vector<8x8xf32> to vector<8xf32>
    %76 = vector.shape_cast %75 : vector<8xf32> to vector<8x1xf32>
    %77 = tpu.reciprocal %76 {approx = true} : vector<8x1xf32> -> vector<8x1xf32>
    %78 = vector.broadcast %77 : vector<8x1xf32> to vector<8x8xf32>
    %79 = arith.mulf %74, %78 : vector<8x8xf32>
    %cst_55 = arith.constant dense<0.000000e+00> : vector<8x8xf32>
    %80 = tpu.matmul %79, %68, %cst_55 {dimension_numbers = #tpu.dot_dimension_numbers<[1], [0], [0], [1], [0, 0, 1, 1], [], []>} : vector<8x8xf32>, vector<8x8xf32>, vector<8x8xf32> -> vector<8x8xf32>
    %c1_56 = arith.constant 1 : index
    %c0_57 = arith.constant 0 : index
    %c0_58 = arith.constant 0 : index
    %81 = vector.load %arg2[%c1_56, %c0_57, %c0_58] : memref<4x8x32xf32, #tpu.memory_space<vmem>>, vector<1x8x32xf32>
    %82 = vector.shape_cast %81 : vector<1x8x32xf32> to vector<8x32xf32>
    %cst_59 = arith.constant dense<0.000000e+00> : vector<8x32xf32>
    %83 = tpu.matmul %80, %82, %cst_59 {dimension_numbers = #tpu.dot_dimension_numbers<[1], [0], [0], [1], [0, 0, 1, 1], [], []>} : vector<8x8xf32>, vector<8x32xf32>, vector<8x32xf32> -> vector<8x32xf32>
    %84 = arith.addf %65, %83 : vector<8x32xf32>
    %85 = vector.extract_strided_slice %27 {offsets = [0, 0], sizes = [8, 8], strides = [1, 1]} : vector<16x8xf32> to vector<8x8xf32>
    %86 = vector.extract_strided_slice %30 {offsets = [0, 0], sizes = [8, 8], strides = [1, 1]} : vector<16x8xf32> to vector<8x8xf32>
    %87 = vector.extract_strided_slice %33 {offsets = [0, 0], sizes = [8, 8], strides = [1, 1]} : vector<16x8xf32> to vector<8x8xf32>
    %cst_60 = arith.constant dense<0.000000e+00> : vector<8x8xf32>
    %88 = tpu.matmul %85, %86, %cst_60 {dimension_numbers = #tpu.dot_dimension_numbers<[1], [1], [0], [0], [0, 0, 1, 0], [], []>} : vector<8x8xf32>, vector<8x8xf32>, vector<8x8xf32> -> vector<8x8xf32>
    %cst_61 = arith.constant dense<0xFF800000> : vector<8xf32>
    %89 = vector.multi_reduction <maximumf>, %88, %cst_61 [1] : vector<8x8xf32> to vector<8xf32>
    %90 = vector.shape_cast %89 : vector<8xf32> to vector<8x1xf32>
    %91 = vector.broadcast %90 : vector<8x1xf32> to vector<8x8xf32>
    %92 = arith.subf %88, %91 : vector<8x8xf32>
    %93 = math.exp %92 : vector<8x8xf32>
    %cst_62 = arith.constant dense<0.000000e+00> : vector<8xf32>
    %94 = vector.multi_reduction <add>, %93, %cst_62 [1] : vector<8x8xf32> to vector<8xf32>
    %95 = vector.shape_cast %94 : vector<8xf32> to vector<8x1xf32>
    %96 = tpu.reciprocal %95 {approx = true} : vector<8x1xf32> -> vector<8x1xf32>
    %97 = vector.broadcast %96 : vector<8x1xf32> to vector<8x8xf32>
    %98 = arith.mulf %93, %97 : vector<8x8xf32>
    %cst_63 = arith.constant dense<0.000000e+00> : vector<8x8xf32>
    %99 = tpu.matmul %98, %87, %cst_63 {dimension_numbers = #tpu.dot_dimension_numbers<[1], [0], [0], [1], [0, 0, 1, 1], [], []>} : vector<8x8xf32>, vector<8x8xf32>, vector<8x8xf32> -> vector<8x8xf32>
    %c2_64 = arith.constant 2 : index
    %c0_65 = arith.constant 0 : index
    %c0_66 = arith.constant 0 : index
    %100 = vector.load %arg2[%c2_64, %c0_65, %c0_66] : memref<4x8x32xf32, #tpu.memory_space<vmem>>, vector<1x8x32xf32>
    %101 = vector.shape_cast %100 : vector<1x8x32xf32> to vector<8x32xf32>
    %cst_67 = arith.constant dense<0.000000e+00> : vector<8x32xf32>
    %102 = tpu.matmul %99, %101, %cst_67 {dimension_numbers = #tpu.dot_dimension_numbers<[1], [0], [0], [1], [0, 0, 1, 1], [], []>} : vector<8x8xf32>, vector<8x32xf32>, vector<8x32xf32> -> vector<8x32xf32>
    %103 = arith.addf %84, %102 : vector<8x32xf32>
    %104 = vector.extract_strided_slice %38 {offsets = [0, 0], sizes = [8, 8], strides = [1, 1]} : vector<16x8xf32> to vector<8x8xf32>
    %105 = vector.extract_strided_slice %41 {offsets = [0, 0], sizes = [8, 8], strides = [1, 1]} : vector<16x8xf32> to vector<8x8xf32>
    %106 = vector.extract_strided_slice %44 {offsets = [0, 0], sizes = [8, 8], strides = [1, 1]} : vector<16x8xf32> to vector<8x8xf32>
    %cst_68 = arith.constant dense<0.000000e+00> : vector<8x8xf32>
    %107 = tpu.matmul %104, %105, %cst_68 {dimension_numbers = #tpu.dot_dimension_numbers<[1], [1], [0], [0], [0, 0, 1, 0], [], []>} : vector<8x8xf32>, vector<8x8xf32>, vector<8x8xf32> -> vector<8x8xf32>
    %cst_69 = arith.constant dense<0xFF800000> : vector<8xf32>
    %108 = vector.multi_reduction <maximumf>, %107, %cst_69 [1] : vector<8x8xf32> to vector<8xf32>
    %109 = vector.shape_cast %108 : vector<8xf32> to vector<8x1xf32>
    %110 = vector.broadcast %109 : vector<8x1xf32> to vector<8x8xf32>
    %111 = arith.subf %107, %110 : vector<8x8xf32>
    %112 = math.exp %111 : vector<8x8xf32>
    %cst_70 = arith.constant dense<0.000000e+00> : vector<8xf32>
    %113 = vector.multi_reduction <add>, %112, %cst_70 [1] : vector<8x8xf32> to vector<8xf32>
    %114 = vector.shape_cast %113 : vector<8xf32> to vector<8x1xf32>
    %115 = tpu.reciprocal %114 {approx = true} : vector<8x1xf32> -> vector<8x1xf32>
    %116 = vector.broadcast %115 : vector<8x1xf32> to vector<8x8xf32>
    %117 = arith.mulf %112, %116 : vector<8x8xf32>
    %cst_71 = arith.constant dense<0.000000e+00> : vector<8x8xf32>
    %118 = tpu.matmul %117, %106, %cst_71 {dimension_numbers = #tpu.dot_dimension_numbers<[1], [0], [0], [1], [0, 0, 1, 1], [], []>} : vector<8x8xf32>, vector<8x8xf32>, vector<8x8xf32> -> vector<8x8xf32>
    %c3_72 = arith.constant 3 : index
    %c0_73 = arith.constant 0 : index
    %c0_74 = arith.constant 0 : index
    %119 = vector.load %arg2[%c3_72, %c0_73, %c0_74] : memref<4x8x32xf32, #tpu.memory_space<vmem>>, vector<1x8x32xf32>
    %120 = vector.shape_cast %119 : vector<1x8x32xf32> to vector<8x32xf32>
    %cst_75 = arith.constant dense<0.000000e+00> : vector<8x32xf32>
    %121 = tpu.matmul %118, %120, %cst_75 {dimension_numbers = #tpu.dot_dimension_numbers<[1], [0], [0], [1], [0, 0, 1, 1], [], []>} : vector<8x8xf32>, vector<8x32xf32>, vector<8x32xf32> -> vector<8x32xf32>
    %122 = arith.addf %103, %121 : vector<8x32xf32>
    %123 = vector.broadcast %45 : vector<1x32xf32> to vector<8x32xf32>
    %124 = arith.addf %122, %123 : vector<8x32xf32>
    %c0_76 = arith.constant 0 : index
    %c0_77 = arith.constant 0 : index
    %125 = vector.load %arg4[%c0_76, %c0_77] : memref<16x32xf32, #tpu.memory_space<vmem>>, vector<8x32xf32>
    tpu.vector_store %arg4[%c0_76, %c0_77], %124 {strides = array<i32>} : memref<16x32xf32, #tpu.memory_space<vmem>>, vector<8x32xf32>,
    %cst_78 = arith.constant 0.000000e+00 : f32
    %126 = vector.broadcast %cst_78 : f32 to vector<8x32xf32>
    %127 = vector.extract_strided_slice %5 {offsets = [8, 0], sizes = [8, 8], strides = [1, 1]} : vector<16x8xf32> to vector<8x8xf32>
    %128 = vector.extract_strided_slice %8 {offsets = [8, 0], sizes = [8, 8], strides = [1, 1]} : vector<16x8xf32> to vector<8x8xf32>
    %129 = vector.extract_strided_slice %11 {offsets = [8, 0], sizes = [8, 8], strides = [1, 1]} : vector<16x8xf32> to vector<8x8xf32>
    %cst_79 = arith.constant dense<0.000000e+00> : vector<8x8xf32>
    %130 = tpu.matmul %127, %128, %cst_79 {dimension_numbers = #tpu.dot_dimension_numbers<[1], [1], [0], [0], [0, 0, 1, 0], [], []>} : vector<8x8xf32>, vector<8x8xf32>, vector<8x8xf32> -> vector<8x8xf32>
    %cst_80 = arith.constant dense<0xFF800000> : vector<8xf32>
    %131 = vector.multi_reduction <maximumf>, %130, %cst_80 [1] : vector<8x8xf32> to vector<8xf32>
    %132 = vector.shape_cast %131 : vector<8xf32> to vector<8x1xf32>
    %133 = vector.broadcast %132 : vector<8x1xf32> to vector<8x8xf32>
    %134 = arith.subf %130, %133 : vector<8x8xf32>
    %135 = math.exp %134 : vector<8x8xf32>
    %cst_81 = arith.constant dense<0.000000e+00> : vector<8xf32>
    %136 = vector.multi_reduction <add>, %135, %cst_81 [1] : vector<8x8xf32> to vector<8xf32>
    %137 = vector.shape_cast %136 : vector<8xf32> to vector<8x1xf32>
    %138 = tpu.reciprocal %137 {approx = true} : vector<8x1xf32> -> vector<8x1xf32>
    %139 = vector.broadcast %138 : vector<8x1xf32> to vector<8x8xf32>
    %140 = arith.mulf %135, %139 : vector<8x8xf32>
    %cst_82 = arith.constant dense<0.000000e+00> : vector<8x8xf32>
    %141 = tpu.matmul %140, %129, %cst_82 {dimension_numbers = #tpu.dot_dimension_numbers<[1], [0], [0], [1], [0, 0, 1, 1], [], []>} : vector<8x8xf32>, vector<8x8xf32>, vector<8x8xf32> -> vector<8x8xf32>
    %c0_83 = arith.constant 0 : index
    %c0_84 = arith.constant 0 : index
    %c0_85 = arith.constant 0 : index
    %142 = vector.load %arg2[%c0_83, %c0_84, %c0_85] : memref<4x8x32xf32, #tpu.memory_space<vmem>>, vector<1x8x32xf32>
    %143 = vector.shape_cast %142 : vector<1x8x32xf32> to vector<8x32xf32>
    %cst_86 = arith.constant dense<0.000000e+00> : vector<8x32xf32>
    %144 = tpu.matmul %141, %143, %cst_86 {dimension_numbers = #tpu.dot_dimension_numbers<[1], [0], [0], [1], [0, 0, 1, 1], [], []>} : vector<8x8xf32>, vector<8x32xf32>, vector<8x32xf32> -> vector<8x32xf32>
    %145 = arith.addf %126, %144 : vector<8x32xf32>
    %146 = vector.extract_strided_slice %16 {offsets = [8, 0], sizes = [8, 8], strides = [1, 1]} : vector<16x8xf32> to vector<8x8xf32>
    %147 = vector.extract_strided_slice %19 {offsets = [8, 0], sizes = [8, 8], strides = [1, 1]} : vector<16x8xf32> to vector<8x8xf32>
    %148 = vector.extract_strided_slice %22 {offsets = [8, 0], sizes = [8, 8], strides = [1, 1]} : vector<16x8xf32> to vector<8x8xf32>
    %cst_87 = arith.constant dense<0.000000e+00> : vector<8x8xf32>
    %149 = tpu.matmul %146, %147, %cst_87 {dimension_numbers = #tpu.dot_dimension_numbers<[1], [1], [0], [0], [0, 0, 1, 0], [], []>} : vector<8x8xf32>, vector<8x8xf32>, vector<8x8xf32> -> vector<8x8xf32>
    %cst_88 = arith.constant dense<0xFF800000> : vector<8xf32>
    %150 = vector.multi_reduction <maximumf>, %149, %cst_88 [1] : vector<8x8xf32> to vector<8xf32>
    %151 = vector.shape_cast %150 : vector<8xf32> to vector<8x1xf32>
    %152 = vector.broadcast %151 : vector<8x1xf32> to vector<8x8xf32>
    %153 = arith.subf %149, %152 : vector<8x8xf32>
    %154 = math.exp %153 : vector<8x8xf32>
    %cst_89 = arith.constant dense<0.000000e+00> : vector<8xf32>
    %155 = vector.multi_reduction <add>, %154, %cst_89 [1] : vector<8x8xf32> to vector<8xf32>
    %156 = vector.shape_cast %155 : vector<8xf32> to vector<8x1xf32>
    %157 = tpu.reciprocal %156 {approx = true} : vector<8x1xf32> -> vector<8x1xf32>
    %158 = vector.broadcast %157 : vector<8x1xf32> to vector<8x8xf32>
    %159 = arith.mulf %154, %158 : vector<8x8xf32>
    %cst_90 = arith.constant dense<0.000000e+00> : vector<8x8xf32>
    %160 = tpu.matmul %159, %148, %cst_90 {dimension_numbers = #tpu.dot_dimension_numbers<[1], [0], [0], [1], [0, 0, 1, 1], [], []>} : vector<8x8xf32>, vector<8x8xf32>, vector<8x8xf32> -> vector<8x8xf32>
    %c1_91 = arith.constant 1 : index
    %c0_92 = arith.constant 0 : index
    %c0_93 = arith.constant 0 : index
    %161 = vector.load %arg2[%c1_91, %c0_92, %c0_93] : memref<4x8x32xf32, #tpu.memory_space<vmem>>, vector<1x8x32xf32>
    %162 = vector.shape_cast %161 : vector<1x8x32xf32> to vector<8x32xf32>
    %cst_94 = arith.constant dense<0.000000e+00> : vector<8x32xf32>
    %163 = tpu.matmul %160, %162, %cst_94 {dimension_numbers = #tpu.dot_dimension_numbers<[1], [0], [0], [1], [0, 0, 1, 1], [], []>} : vector<8x8xf32>, vector<8x32xf32>, vector<8x32xf32> -> vector<8x32xf32>
    %164 = arith.addf %145, %163 : vector<8x32xf32>
    %165 = vector.extract_strided_slice %27 {offsets = [8, 0], sizes = [8, 8], strides = [1, 1]} : vector<16x8xf32> to vector<8x8xf32>
    %166 = vector.extract_strided_slice %30 {offsets = [8, 0], sizes = [8, 8], strides = [1, 1]} : vector<16x8xf32> to vector<8x8xf32>
    %167 = vector.extract_strided_slice %33 {offsets = [8, 0], sizes = [8, 8], strides = [1, 1]} : vector<16x8xf32> to vector<8x8xf32>
    %cst_95 = arith.constant dense<0.000000e+00> : vector<8x8xf32>
    %168 = tpu.matmul %165, %166, %cst_95 {dimension_numbers = #tpu.dot_dimension_numbers<[1], [1], [0], [0], [0, 0, 1, 0], [], []>} : vector<8x8xf32>, vector<8x8xf32>, vector<8x8xf32> -> vector<8x8xf32>
    %cst_96 = arith.constant dense<0xFF800000> : vector<8xf32>
    %169 = vector.multi_reduction <maximumf>, %168, %cst_96 [1] : vector<8x8xf32> to vector<8xf32>
    %170 = vector.shape_cast %169 : vector<8xf32> to vector<8x1xf32>
    %171 = vector.broadcast %170 : vector<8x1xf32> to vector<8x8xf32>
    %172 = arith.subf %168, %171 : vector<8x8xf32>
    %173 = math.exp %172 : vector<8x8xf32>
    %cst_97 = arith.constant dense<0.000000e+00> : vector<8xf32>
    %174 = vector.multi_reduction <add>, %173, %cst_97 [1] : vector<8x8xf32> to vector<8xf32>
    %175 = vector.shape_cast %174 : vector<8xf32> to vector<8x1xf32>
    %176 = tpu.reciprocal %175 {approx = true} : vector<8x1xf32> -> vector<8x1xf32>
    %177 = vector.broadcast %176 : vector<8x1xf32> to vector<8x8xf32>
    %178 = arith.mulf %173, %177 : vector<8x8xf32>
    %cst_98 = arith.constant dense<0.000000e+00> : vector<8x8xf32>
    %179 = tpu.matmul %178, %167, %cst_98 {dimension_numbers = #tpu.dot_dimension_numbers<[1], [0], [0], [1], [0, 0, 1, 1], [], []>} : vector<8x8xf32>, vector<8x8xf32>, vector<8x8xf32> -> vector<8x8xf32>
    %c2_99 = arith.constant 2 : index
    %c0_100 = arith.constant 0 : index
    %c0_101 = arith.constant 0 : index
    %180 = vector.load %arg2[%c2_99, %c0_100, %c0_101] : memref<4x8x32xf32, #tpu.memory_space<vmem>>, vector<1x8x32xf32>
    %181 = vector.shape_cast %180 : vector<1x8x32xf32> to vector<8x32xf32>
    %cst_102 = arith.constant dense<0.000000e+00> : vector<8x32xf32>
    %182 = tpu.matmul %179, %181, %cst_102 {dimension_numbers = #tpu.dot_dimension_numbers<[1], [0], [0], [1], [0, 0, 1, 1], [], []>} : vector<8x8xf32>, vector<8x32xf32>, vector<8x32xf32> -> vector<8x32xf32>
    %183 = arith.addf %164, %182 : vector<8x32xf32>
    %184 = vector.extract_strided_slice %38 {offsets = [8, 0], sizes = [8, 8], strides = [1, 1]} : vector<16x8xf32> to vector<8x8xf32>
    %185 = vector.extract_strided_slice %41 {offsets = [8, 0], sizes = [8, 8], strides = [1, 1]} : vector<16x8xf32> to vector<8x8xf32>
    %186 = vector.extract_strided_slice %44 {offsets = [8, 0], sizes = [8, 8], strides = [1, 1]} : vector<16x8xf32> to vector<8x8xf32>
    %cst_103 = arith.constant dense<0.000000e+00> : vector<8x8xf32>
    %187 = tpu.matmul %184, %185, %cst_103 {dimension_numbers = #tpu.dot_dimension_numbers<[1], [1], [0], [0], [0, 0, 1, 0], [], []>} : vector<8x8xf32>, vector<8x8xf32>, vector<8x8xf32> -> vector<8x8xf32>
    %cst_104 = arith.constant dense<0xFF800000> : vector<8xf32>
    %188 = vector.multi_reduction <maximumf>, %187, %cst_104 [1] : vector<8x8xf32> to vector<8xf32>
    %189 = vector.shape_cast %188 : vector<8xf32> to vector<8x1xf32>
    %190 = vector.broadcast %189 : vector<8x1xf32> to vector<8x8xf32>
    %191 = arith.subf %187, %190 : vector<8x8xf32>
    %192 = math.exp %191 : vector<8x8xf32>
    %cst_105 = arith.constant dense<0.000000e+00> : vector<8xf32>
    %193 = vector.multi_reduction <add>, %192, %cst_105 [1] : vector<8x8xf32> to vector<8xf32>
    %194 = vector.shape_cast %193 : vector<8xf32> to vector<8x1xf32>
    %195 = tpu.reciprocal %194 {approx = true} : vector<8x1xf32> -> vector<8x1xf32>
    %196 = vector.broadcast %195 : vector<8x1xf32> to vector<8x8xf32>
    %197 = arith.mulf %192, %196 : vector<8x8xf32>
    %cst_106 = arith.constant dense<0.000000e+00> : vector<8x8xf32>
    %198 = tpu.matmul %197, %186, %cst_106 {dimension_numbers = #tpu.dot_dimension_numbers<[1], [0], [0], [1], [0, 0, 1, 1], [], []>} : vector<8x8xf32>, vector<8x8xf32>, vector<8x8xf32> -> vector<8x8xf32>
    %c3_107 = arith.constant 3 : index
    %c0_108 = arith.constant 0 : index
    %c0_109 = arith.constant 0 : index
    %199 = vector.load %arg2[%c3_107, %c0_108, %c0_109] : memref<4x8x32xf32, #tpu.memory_space<vmem>>, vector<1x8x32xf32>
    %200 = vector.shape_cast %199 : vector<1x8x32xf32> to vector<8x32xf32>
    %cst_110 = arith.constant dense<0.000000e+00> : vector<8x32xf32>
    %201 = tpu.matmul %198, %200, %cst_110 {dimension_numbers = #tpu.dot_dimension_numbers<[1], [0], [0], [1], [0, 0, 1, 1], [], []>} : vector<8x8xf32>, vector<8x32xf32>, vector<8x32xf32> -> vector<8x32xf32>
    %202 = arith.addf %183, %201 : vector<8x32xf32>
    %203 = vector.broadcast %45 : vector<1x32xf32> to vector<8x32xf32>
    %204 = arith.addf %202, %203 : vector<8x32xf32>
    %c8_111 = arith.constant 8 : index
    %c0_112 = arith.constant 0 : index
    %205 = vector.load %arg4[%c8_111, %c0_112] : memref<16x32xf32, #tpu.memory_space<vmem>>, vector<8x32xf32>
    tpu.vector_store %arg4[%c8_111, %c0_112], %204 {strides = array<i32>} : memref<16x32xf32, #tpu.memory_space<vmem>>, vector<8x32xf32>,
    return
  }
}

</mosaic_0001>

<bundles_post_ra>
// kernel: tpu_custom_call.1
= control target key start
LH: loop header
LB: loop body
LE: loop exit
PB: predicated region body
PF: predicated region fallthrough
CT: control target
= control target key end

     0   :  { %vm24_vm0 = vcmask 261120   ;;  %s1570_s0 = inlined_call_operand.vmem [shape: f32[16,32], index: 0, kind: input, shape index: {}]   ;;  %s1571_s1 = inlined_call_operand.vmem [shape: f32[12,32,8], index: 1, kind: input, shape index: {}]   ;;  %s1572_s2 = inlined_call_operand.vmem [shape: f32[4,8,32], index: 2, kind: input, shape index: {}]   ;;  %s1573_s3 = inlined_call_operand.vmem [shape: f32[1,32], index: 3, kind: input, shape index: {}]   ;;  %s1574_s4 = inlined_call_operand.hbm [shape: f32[16,32], index: 4, kind: output, shape index: {}]  }
   0x1   :  { %v23_v0 = vld [vmem:[%s1571_s1 + $0x18] sm:$0xff]  ;;  %v22_v2 = vld [vmem:[%s1571_s1 + $0x10] sm:$0xff]  ;;  %v21_v6 = vld [vmem:[%s1571_s1 + $0x8] sm:$0xff] }
   0x2   :  { %v1081_v1 = vld [vmem:[%s1571_s1 + $0x98] sm:$0xff]  ;;  %43 = vmatpush.msra.mxu0 %v23_v0  ;;  %v1080_v3 = vld [vmem:[%s1571_s1 + $0x90] sm:$0xff]  ;;  %v1079_v7 = vld [vmem:[%s1571_s1 + $0x88] sm:$0xff] }
   0x3   :  { %73 = vmatpush.msra.mxu1 %v1081_v1  ;;  %v1093_v4 = vld [vmem:[%s1571_s1 + $0x38] sm:$0xff]  ;;  %v1092_v8 = vld [vmem:[%s1571_s1 + $0x30] sm:$0xff]  ;;  %v20_v10 = vld [vmem:[%s1571_s1] sm:$0xff] }
   0x4   :  { %v1087_v5 = vld [vmem:[%s1571_s1 + $0x118] sm:$0xff]  ;;  %129 = vmatpush.msra.mxu3 %v1093_v4  ;;  %44 = vmatpush.msra.mxu0 %v22_v2  ;;  %v1086_v9 = vld [vmem:[%s1571_s1 + $0x110] sm:$0xff]  ;;  %v1078_v11 = vld [vmem:[%s1571_s1 + $0x80] sm:$0xff] }
   0x5   :  { %101 = vmatpush.msra.mxu2 %v1087_v5  ;;  %74 = vmatpush.msra.mxu1 %v1080_v3  ;;  %v1091_v12 = vld [vmem:[%s1571_s1 + $0x28] sm:$0xff]  ;;  %v1317_v14 = vld [vmem:[%s1570_s0] sm:$0xff]  ;;  %v1099_v17 = vld [vmem:[%s1571_s1 + $0xb8] sm:$0xff] }
   0x6   :  { %130 = vmatpush.msra.mxu3 %v1092_v8  ;;  %v1085_v13 = vld [vmem:[%s1571_s1 + $0x108] sm:$0xff]  ;;  %45 = vmatpush.msra.mxu0 %v21_v6  ;;  %v1090_v15 = vld [vmem:[%s1571_s1 + $0x20] sm:$0xff]  ;;  %v1117_v18 = vld [vmem:[%s1571_s1 + $0xd8] sm:$0xff] }
   0x7   :  { %102 = vmatpush.msra.mxu2 %v1086_v9  ;;  %75 = vmatpush.msra.mxu1 %v1079_v7  ;;  %v1084_v16 = vld [vmem:[%s1571_s1 + $0x100] sm:$0xff]  ;;  %v1111_v19 = vld [vmem:[%s1571_s1 + $0x58] sm:$0xff]  ;;  %v1098_v20 = vld [vmem:[%s1571_s1 + $0xb0] sm:$0xff] }
   0x8   :  { %131 = vmatpush.msra.mxu3 %v1091_v12  ;;  %46 = vmatpush.msra.mxu0 %v20_v10  ;;  %v1116_v21 = vld [vmem:[%s1571_s1 + $0xd0] sm:$0xff] }
   0x9   :  { %103 = vmatpush.msra.mxu2 %v1085_v13  ;;  %76 = vmatpush.msra.mxu1 %v1078_v11  ;;  %v1110_v22 = vld [vmem:[%s1571_s1 + $0x50] sm:$0xff] }
   0xa   :  { %1076 = vmatmul.msk.f32.vlgmr.msra.gmra.mxu0 %vm24_vm0, %v1317_v14  ;;  %1082 = vmatmul.msk.f32.vlgmr.msra.gmra.mxu1 %vm24_vm0, %v1317_v14 }
   0xb   :  { %132 = vmatpush.msra.mxu3 %v1090_v15  ;;  %104 = vmatpush.msra.mxu2 %v1084_v16 }
   0xc   :  { %1094 = vmatmul.msk.f32.vlgmr.msra.gmra.mxu3 %vm24_vm0, %v1317_v14  ;;  %1088 = vmatmul.msk.f32.vlgmr.msra.gmra.mxu2 %vm24_vm0, %v1317_v14 }
   0xd   :  { %159 = vmatpush.msrb.mxu0 %v1099_v17  ;;  %245 = vmatpush.msrb.mxu3 %v1117_v18 }
   0xe   :  { %9 = vsyncpa [#allocation3], 0  ;;  %215 = vmatpush.msrb.mxu2 %v1111_v19  ;;  %v1097_v23 = vld [vmem:[%s1571_s1 + $0xa8] sm:$0xff]  ;;  %v1096_v27 = vld [vmem:[%s1571_s1 + $0xa0] sm:$0xff]  ;;  %vm371_vm1 = vcmask 64512   ;;  %s1064_s20 = sshll.u32 %s1574_s4, 4  ;;  %s1065_s20 = int_to_ptr.hbm [resolvable:$true] %s1064_s20 }
   0xf   :  { %v1115_v24 = vld [vmem:[%s1571_s1 + $0xc8] sm:$0xff]  ;;  %160 = vmatpush.msrb.mxu0 %v1098_v20  ;;  %246 = vmatpush.msrb.mxu3 %v1116_v21  ;;  %v1114_v28 = vld [vmem:[%s1571_s1 + $0xc0] sm:$0xff]  ;;  %v1123_v30 = vld [vmem:[%s1571_s1 + $0x158] sm:$0xff]  ;;  %s1246_s21 = smov 8  }
  0x10   :  { %v1360_v25 = vld [vmem:[%s1570_s0 + $0x8] sm:$0xff]  ;;  %216 = vmatpush.msrb.mxu2 %v1110_v22  ;;  %v1108_v29 = vld [vmem:[%s1571_s1 + $0x40] sm:$0xff]  ;;  %v1135_v31 = vld [vmem:[%s1571_s1 + $0xf8] sm:$0xff]  ;;  %s1245_s0 = smov 128  }
  0x11   :  { %v1109_v26 = vld [vmem:[%s1571_s1 + $0x48] sm:$0xff]  ;;  %161 = vmatpush.msrb.mxu0 %v1097_v23  ;;  %247 = vmatpush.msrb.mxu3 %v1115_v24  ;;  %v1122_v32 = vld [vmem:[%s1571_s1 + $0x150] sm:$0xff]  ;;  %v1120_v35 = vld [vmem:[%s1571_s1 + $0x140] sm:$0xff] }
  0x12   :  { %1077 = vmatmul.msk.f32.gmra.mxu0 %vm24_vm0, %v1360_v25  ;;  %217 = vmatpush.msrb.mxu2 %v1109_v26  ;;  %v1134_v33 = vld [vmem:[%s1571_s1 + $0xf0] sm:$0xff]  ;;  %v1121_v34 = vld [vmem:[%s1571_s1 + $0x148] sm:$0xff]  ;;  %v1105_v36 = vld [vmem:[%s1571_s1 + $0x138] sm:$0xff] }
  0x13   :  { %162 = vmatpush.msrb.mxu0 %v1096_v27  ;;  %248 = vmatpush.msrb.mxu3 %v1114_v28  ;;  %v1104_v37 = vld [vmem:[%s1571_s1 + $0x130] sm:$0xff]  ;;  %v1103_v38 = vld [vmem:[%s1571_s1 + $0x128] sm:$0xff]  ;;  %v1132_v40 = vld [vmem:[%s1571_s1 + $0xe0] sm:$0xff] }
  0x14   :  { %1095 = vmatmul.msk.f32.gmra.mxu3 %vm24_vm0, %v1360_v25  ;;  %1089 = vmatmul.msk.f32.gmra.mxu2 %vm24_vm0, %v1360_v25  ;;  %v1133_v39 = vld [vmem:[%s1571_s1 + $0xe8] sm:$0xff]  ;;  %v1102_v41 = vld [vmem:[%s1571_s1 + $0x120] sm:$0xff]  ;;  %v1129_v42 = vld [vmem:[%s1571_s1 + $0x78] sm:$0xff] }
  0x15   :  { %218 = vmatpush.msrb.mxu2 %v1108_v29  ;;  %273 = vmatpush.msra.mxu0 %v1123_v30  ;;  %v1128_v43 = vld [vmem:[%s1571_s1 + $0x70] sm:$0xff]  ;;  %v1127_v44 = vld [vmem:[%s1571_s1 + $0x68] sm:$0xff]  ;;  %v1126_v45 = vld [vmem:[%s1571_s1 + $0x60] sm:$0xff] }
  0x16   :  { %1083 = vmatmul.msk.f32.gmra.mxu1 %vm24_vm0, %v1360_v25  ;;  %v1141_v59 = vld [vmem:[%s1571_s1 + $0x178] sm:$0xff]  ;;  %v1140_v60 = vld [vmem:[%s1571_s1 + $0x170] sm:$0xff]  ;;  %v1139_v61 = vld [vmem:[%s1571_s1 + $0x168] sm:$0xff] }
  0x17   :  { %331 = vmatpush.msra.mxu2 %v1135_v31  ;;  %274 = vmatpush.msra.mxu0 %v1122_v32  ;;  %v1138_v62 = vld [vmem:[%s1571_s1 + $0x160] sm:$0xff] }
  0x18   :  { %187 = vmatpush.msrb.mxu1 %v1105_v36  ;;  %359 = vmatpush.msra.mxu3 %v1141_v59  ;;  %v432_v30 = vld [vmem:[%s1572_s2] sm:$0xff] }
  0x19   :  { %332 = vmatpush.msra.mxu2 %v1134_v33  ;;  %275 = vmatpush.msra.mxu0 %v1121_v34 }
  0x1a   :  { %1100 = vmatmul.msk.f32.vlgmr.msrb.gmra.mxu0 %vm24_vm0, %v1317_v14  ;;  %188 = vmatpush.msrb.mxu1 %v1104_v37 }
  0x1b   :  { %276 = vmatpush.msra.mxu0 %v1120_v35  ;;  %333 = vmatpush.msra.mxu2 %v1133_v39 }
  0x1c   :  { %1118 = vmatmul.msk.f32.vlgmr.msrb.gmra.mxu3 %vm24_vm0, %v1317_v14  ;;  %1112 = vmatmul.msk.f32.vlgmr.msrb.gmra.mxu2 %vm24_vm0, %v1317_v14 }
  0x1d   :  { %189 = vmatpush.msrb.mxu1 %v1103_v38  ;;  %334 = vmatpush.msra.mxu2 %v1132_v40 }
  0x1e   :  { %360 = vmatpush.msra.mxu3 %v1140_v60 }
  0x1f   :  { %190 = vmatpush.msrb.mxu1 %v1102_v41  ;;  %v1150_v41 = vld [vmem:[%s1572_s2 + $0x8] sm:$0xff] }
  0x20   :  { %1106 = vmatmul.msk.f32.vlgmr.msrb.gmra.mxu1 %vm24_vm0, %v1317_v14  ;;  %361 = vmatpush.msra.mxu3 %v1139_v61 }
  0x21   :  { %301 = vmatpush.msra.mxu1 %v1129_v42 }
  0x22   :  { %1101 = vmatmul.msk.f32.gmra.mxu0 %vm24_vm0, %v1360_v25  ;;  %362 = vmatpush.msra.mxu3 %v1138_v62 }
  0x23   :  { %302 = vmatpush.msra.mxu1 %v1128_v43 }
  0x24   :  { %1113 = vmatmul.msk.f32.gmra.mxu2 %vm24_vm0, %v1360_v25  ;;  %1119 = vmatmul.msk.f32.gmra.mxu3 %vm24_vm0, %v1360_v25 }
  0x25   :  { %303 = vmatpush.msra.mxu1 %v1127_v44  ;;  %v1156_v44 = vld [vmem:[%s1572_s2 + $0x10] sm:$0xff] }
  0x27   :  { %304 = vmatpush.msra.mxu1 %v1126_v45 }
  0x28   :  { %1107 = vmatmul.msk.f32.gmra.mxu1 %vm24_vm0, %v1360_v25 }
  0x2a   :  { %1124 = vmatmul.msk.f32.vlgmr.msra.gmra.mxu0 %vm24_vm0, %v1317_v14 }
  0x2c   :  { %1136 = vmatmul.msk.f32.vlgmr.msra.gmra.mxu2 %vm24_vm0, %v1317_v14  ;;  %1142 = vmatmul.msk.f32.vlgmr.msra.gmra.mxu3 %vm24_vm0, %v1317_v14 }
  0x30   :  { %1130 = vmatmul.msk.f32.vlgmr.msra.gmra.mxu1 %vm24_vm0, %v1317_v14 }
  0x32   :  { %1125 = vmatmul.msk.f32.gmra.mxu0 %vm24_vm0, %v1360_v25 }
  0x34   :  { %1137 = vmatmul.msk.f32.gmra.mxu2 %vm24_vm0, %v1360_v25  ;;  %1143 = vmatmul.msk.f32.gmra.mxu3 %vm24_vm0, %v1360_v25 }
  0x38   :  { %1131 = vmatmul.msk.f32.gmra.mxu1 %vm24_vm0, %v1360_v25 }
  0x87   :  { %v48_v46 = vpop.f32.mrf.mxu0  ;;  %v78_v47 = vpop.f32.mrf.mxu1 }
  0x88   :  { %v54_v48 = vmul.f32 0.17677669, %v48_v46  ;;  %1144 = vmatpush.xpose.msk.msrb.mxu0 %vm371_vm1, %v78_v47 }
  0x8b   :  { %1145 = vmatmul.msk.f32.vlgmr.msrb.gmra.mxu0 %vm371_vm1, %v54_v48 }
  0x8c   :  { %513 = vmatpush.msra.mxu0 %v1150_v41 }
  0x8e   :  { %621 = vmatpush.msrb.mxu0 %v1156_v44 }
  0x8f   :  { %v1460_v49 = vpop.f32.mrf.mxu0  ;;  %v134_v50 = vpop.f32.mrf.mxu3 }
  0x90   :  { %v106_v51 = vpop.f32.mrf.mxu2  ;;  %v140_v55 = vmul.f32 0.17677669, %v134_v50 }
  0x91   :  { %427 = vmatpush.msrb.mxu1 %v106_v51  ;;  %v55_v51 = vmul.f32 0.17677669, %v1460_v49 }
  0x93   :  { %v81_v12 = vpop.f32.mrf.mxu1  ;;  %536 = vmatpush.msra.mxu1 %v432_v30 }
  0x97   :  { %v1462_v52 = vpop.f32.mrf.mxu3  ;;  %v164_v53 = vpop.f32.mrf.mxu0 }
  0x98   :  { %v1464_v54 = vpop.f32.mrf.mxu2  ;;  %1147 = vmatpush.xpose.msk.msrb.mxu2 %vm371_vm1, %v164_v53  ;;  %v1527_v53 = vld [vmem:[%s1572_s2 + $0x18] sm:$0xff] }
  0x9b   :  { %1148 = vmatmul.msk.f32.vlgmr.msrb.gmra.mxu2 %vm371_vm1, %v140_v55 }
  0x9d   :  { %v192_v14 = vpop.f32.mrf.mxu1 }
  0x9e   :  { %488 = vmatpush.msrb.mxu3 %v192_v14 }
  0x9f   :  { %v250_v56 = vpop.f32.mrf.mxu3  ;;  %v167_v63 = vpop.f32.mrf.mxu0 }
  0xa0   :  { %v220_v57 = vpop.f32.mrf.mxu2  ;;  %1153 = vmatpush.xpose.msk.msra.mxu2 %vm371_vm1, %v250_v56 }
  0xa1   :  { %v226_v58 = vmul.f32 0.17677669, %v220_v57 }
  0xa3   :  { %1154 = vmatmul.msk.f32.vlgmr.msra.gmra.mxu2 %vm371_vm1, %v226_v58 }
  0xa5   :  { %v195_v40 = vpop.f32.mrf.mxu1 }
  0xa7   :  { %v278_v0 = vpop.f32.mrf.mxu0  ;;  %v1495_v11 = vpop.f32.mrf.mxu3 }
  0xa8   :  { %v1488_v2 = vpop.f32.mrf.mxu2  ;;  %596 = vmatpush.msra.mxu3 %v278_v0 }
  0xad   :  { %v306_v42 = vpop.f32.mrf.mxu1 }
  0xae   :  { %v312_v46 = vmul.f32 0.17677669, %v306_v42 }
  0xaf   :  { %v1486_v1 = vpop.f32.mrf.mxu0  ;;  %v364_v13 = vpop.f32.mrf.mxu3 }
  0xb0   :  { %v336_v5 = vpop.f32.mrf.mxu2  ;;  %682 = vmatpush.msrb.mxu2 %v364_v13 }
  0xb2   :  { %1166 = vmatpush.xpose.msk.msra.mxu2 %vm371_vm1, %v167_v63 }
  0xb5   :  { %v1511_v43 = vpop.f32.mrf.mxu1 }
  0xb7   :  { %v367_v47 = vpop.f32.mrf.mxu3 }
  0xb8   :  { %v1491_v6 = vpop.f32.mrf.mxu2 }
 0x108   :  { %v395_v3 = vpop.f32.mrf.mxu0 }
 0x109   :  { %v398_v4 = vsel %vm371_vm1, %v395_v3, -inf }
 0x10a   :  { %399 = vmax.xlane.f32.xlu2 %v398_v4 }
 0x11e   :  { %v456_v7 = vpop.f32.mrf.mxu2 }
 0x11f   :  { %v459_v8 = vsel %vm371_vm1, %v456_v7, -inf }
 0x120   :  { %460 = vmax.xlane.f32.xlu0 %v459_v8 }
 0x126   :  { %v564_v9 = vpop.f32.mrf.mxu2 }
 0x127   :  { %v567_v10 = vsel %vm371_vm1, %v564_v9, -inf }
 0x128   :  { %568 = vmax.xlane.f32.xlu0 %v567_v10 }
 0x17d   :  { %v400_v15 = vpop.xlane.xlu2 %399 }
 0x17e   :  { %v401_v16 = vsub.f32 %v395_v3, %v400_v15  ;;  %v141_v15 = vmul.f32 0.17677669, %v1462_v52 }
 0x180   :  { %v402_v17 = vmul.f32 1.442695, %v401_v16  ;;  %v227_v16 = vmul.f32 0.17677669, %v1488_v2 }
 0x182   :  { %1186 = vpow2.f32 %v402_v17 }
 0x188   :  { %v1187_v18 = vpop.eup %1186 }
 0x189   :  { %v404_v19 = vsel %vm371_vm1, %v1187_v18, 0.0 }
 0x18a   :  { %405 = vadd.xlane.f32.xlu2 %v404_v19 }
 0x193   :  { %v461_v20 = vpop.xlane.xlu0 %460 }
 0x194   :  { %v462_v21 = vsub.f32 %v456_v7, %v461_v20 }
 0x196   :  { %v463_v22 = vmul.f32 1.442695, %v462_v21 }
 0x198   :  { %1188 = vpow2.f32 %v463_v22 }
 0x19b   :  { %v569_v23 = vpop.xlane.xlu0 %568 }
 0x19c   :  { %v570_v24 = vsub.f32 %v564_v9, %v569_v23  ;;  %v313_v23 = vmul.f32 0.17677669, %v1511_v43 }
 0x19e   :  { %v1189_v25 = vpop.eup %1188  ;;  %v571_v26 = vmul.f32 1.442695, %v570_v24 }
 0x19f   :  { %v465_v27 = vsel %vm371_vm1, %v1189_v25, 0.0 }
 0x1a0   :  { %1190 = vpow2.f32 %v571_v26  ;;  %466 = vadd.xlane.f32.xlu1 %v465_v27 }
 0x1a6   :  { %v1191_v28 = vpop.eup %1190 }
 0x1a7   :  { %v573_v29 = vsel %vm371_vm1, %v1191_v28, 0.0 }
 0x1a8   :  { %574 = vadd.xlane.f32.xlu1 %v573_v29 }
 0x1fd   :  { %v406_v31 = vpop.xlane.xlu2 %405 }
 0x1fe   :  { %1192 = vrcp.f32 %v406_v31 }
 0x204   :  { %v1193_v32 = vpop.eup %1192 }
 0x205   :  { %v408_v33 = vmul.f32 %v1193_v32, %v1187_v18 }
 0x207   :  { %1146 = vmatmul.msk.f32.vlgmr.msrb.gmra.mxu1 %vm371_vm1, %v408_v33 }
 0x208   :  { %1158 = vmatpush.xpose.msk.msrb.mxu1 %vm371_vm1, %v336_v5 }
 0x213   :  { %v467_v34 = vpop.xlane.xlu1 %466 }
 0x214   :  { %1194 = vrcp.f32 %v467_v34 }
 0x21a   :  { %v1195_v35 = vpop.eup %1194 }
 0x21b   :  { %v469_v36 = vmul.f32 %v1195_v35, %v1189_v25  ;;  %v575_v37 = vpop.xlane.xlu1 %574 }
 0x21c   :  { %1196 = vrcp.f32 %v575_v37 }
 0x21d   :  { %1149 = vmatmul.msk.f32.vlgmr.msrb.gmra.mxu3 %vm371_vm1, %v469_v36 }
 0x21e   :  { %707 = vmatpush.msrb.mxu3 %v1527_v53 }
 0x222   :  { %v1197_v38 = vpop.eup %1196 }
 0x223   :  { %v577_v39 = vmul.f32 %v1197_v38, %v1191_v28 }
 0x225   :  { %1155 = vmatmul.msk.f32.vlgmr.msra.gmra.mxu3 %vm371_vm1, %v577_v39 }
 0x226   :  { %834 = vmatpush.msra.mxu3 %v195_v40 }
 0x284   :  { %v429_v45 = vpop.f32.mrf.mxu1 }
 0x285   :  { %1152 = vmatmul.msk.f32.vlgmr.msra.gmra.mxu1 %vm371_vm1, %v429_v45 }
 0x286   :  { %773 = vmatpush.msra.mxu1 %v1464_v54 }
 0x28d   :  { %1159 = vmatmul.msk.f32.vlgmr.msrb.gmra.mxu1 %vm371_vm1, %v312_v46 }
 0x28e   :  { %881 = vmatpush.msrb.mxu1 %v432_v30 }
 0x2a0   :  { %v490_v48 = vpop.f32.mrf.mxu3 }
 0x2a1   :  { %1151 = vmatmul.msk.f32.vlgmr.msra.gmra.mxu0 %vm371_vm1, %v490_v48 }
 0x2a2   :  { %1163 = vmatpush.xpose.msk.msra.mxu0 %vm371_vm1, %v81_v12 }
 0x2a8   :  { %v598_v50 = vpop.f32.mrf.mxu3 }
 0x2a9   :  { %1157 = vmatmul.msk.f32.vlgmr.msrb.gmra.mxu0 %vm371_vm1, %v598_v50 }
 0x2aa   :  { %858 = vmatpush.msrb.mxu0 %v1150_v41 }
 0x2b1   :  { %1164 = vmatmul.msk.f32.vlgmr.msra.gmra.mxu0 %vm371_vm1, %v55_v51 }
 0x2b2   :  { %965 = vmatpush.msra.mxu0 %v1156_v44 }
 0x302   :  { %v538_v54 = vpop.f32.mrf.mxu1 }
 0x30a   :  { %v650_v55 = vpop.f32.mrf.mxu1 }
 0x30b   :  { %v653_v56 = vsel %vm371_vm1, %v650_v55, -inf }
 0x30c   :  { %654 = vmax.xlane.f32.xlu2 %v653_v56 }
 0x31e   :  { %v515_v57 = vpop.f32.mrf.mxu0 }
 0x31f   :  { %v539_v58 = vadd.f32 %v538_v54, %v515_v57 }
 0x326   :  { %v623_v59 = vpop.f32.mrf.mxu0 }
 0x327   :  { %v626_v49 = vadd.f32 %v623_v59, %v539_v58 }
 0x32e   :  { %v741_v60 = vpop.f32.mrf.mxu0 }
 0x32f   :  { %v744_v61 = vsel %vm371_vm1, %v741_v60, -inf }
 0x330   :  { %745 = vmax.xlane.f32.xlu0 %v744_v61 }
 0x37f   :  { %v655_v62 = vpop.xlane.xlu2 %654 }
 0x380   :  { %v656_v63 = vsub.f32 %v650_v55, %v655_v62 }
 0x382   :  { %v657_v0 = vmul.f32 1.442695, %v656_v63 }
 0x384   :  { %1198 = vpow2.f32 %v657_v0 }
 0x38a   :  { %v1199_v3 = vpop.eup %1198 }
 0x38b   :  { %v659_v4 = vsel %vm371_vm1, %v1199_v3, 0.0 }
 0x38c   :  { %660 = vadd.xlane.f32.xlu0 %v659_v4 }
 0x3a3   :  { %v746_v5 = vpop.xlane.xlu0 %745 }
 0x3a4   :  { %v747_v7 = vsub.f32 %v741_v60, %v746_v5 }
 0x3a6   :  { %v748_v8 = vmul.f32 1.442695, %v747_v7 }
 0x3a8   :  { %1200 = vpow2.f32 %v748_v8 }
 0x3ae   :  { %v1201_v9 = vpop.eup %1200 }
 0x3af   :  { %v750_v10 = vsel %vm371_vm1, %v1201_v9, 0.0 }
 0x3b0   :  { %751 = vadd.xlane.f32.xlu1 %v750_v10 }
 0x3ff   :  { %v661_v12 = vpop.xlane.xlu0 %660 }
 0x400   :  { %1202 = vrcp.f32 %v661_v12 }
 0x406   :  { %v1203_v13 = vpop.eup %1202 }
 0x407   :  { %v663_v14 = vmul.f32 %v1203_v13, %v1199_v3 }
 0x409   :  { %1160 = vmatmul.msk.f32.vlgmr.msrb.gmra.mxu2 %vm371_vm1, %v663_v14 }
 0x40a   :  { %1172 = vmatpush.xpose.msk.msrb.mxu2 %vm371_vm1, %v1495_v11 }
 0x411   :  { %1167 = vmatmul.msk.f32.vlgmr.msra.gmra.mxu2 %vm371_vm1, %v141_v15 }
 0x412   :  { %1026 = vmatpush.msra.mxu2 %v367_v47 }
 0x419   :  { %1173 = vmatmul.msk.f32.vlgmr.msrb.gmra.mxu2 %vm371_vm1, %v227_v16 }
 0x423   :  { %v752_v17 = vpop.xlane.xlu1 %751 }
 0x424   :  { %1204 = vrcp.f32 %v752_v17 }
 0x42a   :  { %v1205_v18 = vpop.eup %1204 }
 0x42b   :  { %v754_v19 = vmul.f32 %v1205_v18, %v1201_v9 }
 0x42d   :  { %1165 = vmatmul.msk.f32.vlgmr.msra.gmra.mxu1 %vm371_vm1, %v754_v19 }
 0x42e   :  { %1177 = vmatpush.xpose.msk.msra.mxu1 %vm371_vm1, %v1491_v6 }
 0x48c   :  { %v684_v20 = vpop.f32.mrf.mxu2 }
 0x48d   :  { %1162 = vmatmul.msk.f32.vlgmr.msrb.gmra.mxu3 %vm371_vm1, %v684_v20 }
 0x48e   :  { %941 = vmatpush.msrb.mxu3 %v1486_v1  ;;  %v1185_v1 = vld [vmem:[%s1573_s3] ss:$0 sm:$0xff]  ;;  %s1244_s3 = smov [#allocation2]  }
 0x48f   :  { %s1062_s17 = sshll.u32 %s1244_s3, 4  ;;  %s1063_s17 = int_to_ptr.vmem [resolvable:$true] %s1062_s17 }
 0x494   :  { %v802_v52 = vpop.f32.mrf.mxu2 }
 0x495   :  { %v805_v11 = vsel %vm371_vm1, %v802_v52, -inf }
 0x496   :  { %806 = vmax.xlane.f32.xlu1 %v805_v11 }
 0x49c   :  { %v909_v2 = vpop.f32.mrf.mxu2 }
 0x49d   :  { %v912_v21 = vsel %vm371_vm1, %v909_v2, -inf }
 0x49e   :  { %913 = vmax.xlane.f32.xlu0 %v912_v21 }
 0x4aa   :  { %v775_v22 = vpop.f32.mrf.mxu1 }
 0x4ab   :  { %1171 = vmatmul.msk.f32.vlgmr.msrb.gmra.mxu1 %vm371_vm1, %v775_v22 }
 0x4b3   :  { %1178 = vmatmul.msk.f32.vlgmr.msra.gmra.mxu1 %vm371_vm1, %v313_v23 }
 0x509   :  { %v807_v6 = vpop.xlane.xlu1 %806 }
 0x50a   :  { %v808_v24 = vsub.f32 %v802_v52, %v807_v6 }
 0x50c   :  { %v809_v25 = vmul.f32 1.442695, %v808_v24 }
 0x50e   :  { %1206 = vpow2.f32 %v809_v25 }
 0x510   :  { %v709_v26 = vpop.f32.mrf.mxu3 }
 0x511   :  { %v712_v27 = vadd.f32 %v709_v26, %v626_v49  ;;  %v914_v28 = vpop.xlane.xlu0 %913 }
 0x512   :  { %v915_v29 = vsub.f32 %v909_v2, %v914_v28 }
 0x513   :  { %v716_v30 = vadd.f32 %v1185_v1, %v712_v27 }
 0x514   :  { %v1207_v31 = vpop.eup %1206  ;;  %v916_v32 = vmul.f32 1.442695, %v915_v29 }
 0x515   :  { %717 = vst.msk [vmem:[#allocation2] sm:$0xff] %vm24_vm0, %v716_v30  ;;  %v811_v33 = vsel %vm371_vm1, %v1207_v31, 0.0 }
 0x516   :  { %1208 = vpow2.f32 %v916_v32  ;;  %812 = vadd.xlane.f32.xlu1 %v811_v33 }
 0x51c   :  { %v1209_v34 = vpop.eup %1208 }
 0x51d   :  { %v918_v35 = vsel %vm371_vm1, %v1209_v34, 0.0 }
 0x51e   :  { %919 = vadd.xlane.f32.xlu0 %v918_v35 }
 0x528   :  { %v883_v36 = vpop.f32.mrf.mxu1 }
 0x530   :  { %v994_v37 = vpop.f32.mrf.mxu1 }
 0x531   :  { %v997_v38 = vsel %vm371_vm1, %v994_v37, -inf }
 0x532   :  { %998 = vmax.xlane.f32.xlu2 %v997_v38 }
 0x589   :  { %v813_v39 = vpop.xlane.xlu1 %812 }
 0x58a   :  { %1210 = vrcp.f32 %v813_v39 }
 0x590   :  { %v1211_v40 = vpop.eup %1210 }
 0x591   :  { %v815_v41 = vmul.f32 %v1211_v40, %v1207_v31  ;;  %v920_v42 = vpop.xlane.xlu0 %919 }
 0x592   :  { %1212 = vrcp.f32 %v920_v42 }
 0x593   :  { %1168 = vmatmul.msk.f32.vlgmr.msra.gmra.mxu3 %vm371_vm1, %v815_v41 }
 0x594   :  { %1050 = vmatpush.msra.mxu3 %v1527_v53 }
 0x598   :  { %v1213_v43 = vpop.eup %1212 }
 0x599   :  { %v922_v44 = vmul.f32 %v1213_v43, %v1209_v34 }
 0x59b   :  { %1174 = vmatmul.msk.f32.vlgmr.msrb.gmra.mxu3 %vm371_vm1, %v922_v44 }
 0x5a5   :  { %v999_v45 = vpop.xlane.xlu2 %998 }
 0x5a6   :  { %v1000_v46 = vsub.f32 %v994_v37, %v999_v45 }
 0x5a8   :  { %v1001_v47 = vmul.f32 1.442695, %v1000_v46 }
 0x5aa   :  { %1214 = vpow2.f32 %v1001_v47 }
 0x5b0   :  { %v1215_v48 = vpop.eup %1214 }
 0x5b1   :  { %v1003_v50 = vsel %vm371_vm1, %v1215_v48, 0.0 }
 0x5b2   :  { %1004 = vadd.xlane.f32.xlu2 %v1003_v50 }
 0x616   :  { %v836_v51 = vpop.f32.mrf.mxu3 }
 0x617   :  { %1170 = vmatmul.msk.f32.vlgmr.msrb.gmra.mxu0 %vm371_vm1, %v836_v51 }
 0x61e   :  { %v943_v54 = vpop.f32.mrf.mxu3 }
 0x61f   :  { %1176 = vmatmul.msk.f32.vlgmr.msra.gmra.mxu0 %vm371_vm1, %v943_v54 }
 0x625   :  { %v1005_v55 = vpop.xlane.xlu2 %1004 }
 0x626   :  { %1216 = vrcp.f32 %v1005_v55 }
 0x62c   :  { %v1217_v53 = vpop.eup %1216 }
 0x62d   :  { %v1007_v56 = vmul.f32 %v1217_v53, %v1215_v48 }
 0x62f   :  { %1179 = vmatmul.msk.f32.vlgmr.msra.gmra.mxu2 %vm371_vm1, %v1007_v56 }
 0x694   :  { %v860_v58 = vpop.f32.mrf.mxu0 }
 0x695   :  { %v884_v49 = vadd.f32 %v883_v36, %v860_v58 }
 0x69c   :  { %v967_v59 = vpop.f32.mrf.mxu0 }
 0x69d   :  { %v970_v60 = vadd.f32 %v967_v59, %v884_v49 }
 0x6b2   :  { %v1028_v57 = vpop.f32.mrf.mxu2 }
 0x6b3   :  { %1181 = vmatmul.msk.f32.vlgmr.msra.gmra.mxu3 %vm371_vm1, %v1028_v57 }
 0x736   :  { %v1052_v61 = vpop.f32.mrf.mxu3 }
 0x737   :  { %v1055_v62 = vadd.f32 %v1052_v61, %v970_v60 }
 0x739   :  { %v1056_v63 = vadd.f32 %v1185_v1, %v1055_v62 }
 0x73b   :  { %1057 = vst.msk [vmem:[#allocation2 + $0x8] sm:$0xff] %vm24_vm0, %v1056_v63 }
 0x73c   :  { %1070 = dma.vmem_to_hbm [thread:$0]  %s1063_s17, 256, %s1065_s20, [#allocation3], %s1245_s0, %s1245_s0, %s1246_s21  }
 0x73d   :  { %1242 = dma.done.wait [#allocation3], 256  }
 0x73e   :  { %1243 = vsyncadd [#allocation3], 4294967040 }
 0x73f   :  { %1075 = vsyncpa [#allocation3], 1 }

</bundles_post_ra>
